<compile_context>
chip_gen: v7x
topology: tpu7x:2x2x1
jax: 0.10.0
libtpu: 0.0.40
codegen_flags: <defaults>
</compile_context>

<pallas_src>
import functools

import numpy as np

import jax
import jax.numpy as jnp
from jax.experimental import pallas as pl
from jax.experimental.pallas import tpu as pltpu

SQRT2 = 1.4142135623730951


def _gelu(x):
    # exact (erf-based) GELU == PyTorch nn.GELU(approximate='none')
    return 0.5 * x * (1.0 + jax.lax.erf(x / SQRT2))


def _bottleneck_kernel(x_ref, m_ref, w1_ref, w2_ref, w3_ref, o_ref, *, W, HW, B):
    """x_ref: (B, Cin, HW) bf16; m_ref: (8, B*HW) bf16 {0,1} tap masks;
    w1: (width, Cin) bf16; w2: (width, 9*width) bf16 (fused taps);
    w3: (Cout, width) bf16; o_ref: (B, Cout, HW)."""
    L = B * HW
    width = w1_ref.shape[0]

    # Fold this block's B images along the lane axis -> (Cin, B*HW).
    # HW is a multiple of 128, so every piece is lane-tile aligned.
    if B == 1:
        x_slab = x_ref[0]
    else:
        x_slab = jnp.concatenate([x_ref[b] for b in range(B)], axis=1)

    # ---- conv1: 1x1 conv == channel matmul, then GELU ----
    h1 = _gelu(jnp.dot(w1_ref[...], x_slab,
                       preferred_element_type=jnp.float32))        # (width, L) f32

    # ---- conv2: 3x3 conv via in-register im2col + ONE wide-K matmul ----
    # bf16 taps halve XLU roll volume and the 9x-wide cols buffer, but
    # sublane-concatenating 2-byte chunks wants width % 16 == 0 (bf16 tile is
    # 16 sublanes); at tiny / unaligned widths keep the taps f32 and do a
    # single cast of cols (avoids packed sub-tile relayouts).  On v5e
    # (no bf16 VALU) the f32 path is also the cheaper one for the selects.
    tap_dtype = jnp.bfloat16 if width % 16 == 0 else jnp.float32
    h1_t = h1.astype(tap_dtype)

    masks = m_ref[...]                                              # (8, L) bf16
    taps = []
    mi = 0
    for dy in (-1, 0, 1):
        for dx in (-1, 0, 1):
            if dy == 0 and dx == 0:
                taps.append(h1_t)
                continue
            offset = dy * W + dx                                    # static int
            shifted = pltpu.roll(h1_t, shift=(-offset) % L, axis=1)
            # mask is exactly 0/1 -> multiply == select; also kills the
            # cyclic wrap-around of the roll and cross-image leakage.
            taps.append((shifted * masks[mi:mi + 1, :]).astype(tap_dtype))
            mi += 1
    # TODO(synk): at production width, write the taps into a preallocated
    # bf16 VMEM scratch (scratch_shapes) instead of concatenating, to bound
    # live ranges and cap the peak VMEM of the 9x-wide im2col buffer.
    cols = jnp.concatenate(taps, axis=0).astype(jnp.bfloat16)       # (9*width, L)
    h2 = _gelu(jnp.dot(w2_ref[...], cols,
                       preferred_element_type=jnp.float32))         # (width, L) f32

    # ---- conv3: 1x1 conv then GELU ----
    h3 = _gelu(jnp.dot(w3_ref[...], h2.astype(jnp.bfloat16),
                       preferred_element_type=jnp.float32))         # (Cout, L) f32

    # ---- residual add (downsample is None -> identity = input) + GELU ----
    y = _gelu(h3 + x_slab.astype(jnp.float32))                      # (Cout, L) f32

    # Un-fold the lane axis back to per-image tiles (static, 128-aligned).
    for b in range(B):
        o_ref[b] = y[:, b * HW:(b + 1) * HW].astype(o_ref.dtype)


def prepare_params(w1, w2, w3):
    """One-time weight preprocessing (keep it out of the per-call path).
    w1: (width, Cin); w2: (width, width, 3, 3) OIHW; w3: (Cout, width).
    Fuses the 9 conv2 taps into one (width, 9*width) weight where column
    block t = kh*3 + kw holds w2[:, :, kh, kw], and casts everything bf16."""
    width = w1.shape[0]
    w2f = jnp.transpose(w2, (0, 2, 3, 1)).reshape(width, 9 * width)
    return (w1.astype(jnp.bfloat16),
            w2f.astype(jnp.bfloat16),
            w3.astype(jnp.bfloat16))


def _choose_images_per_block(N, Cin, width, Cout, HW, budget_bytes=8 << 20):
    """Largest divisor of N whose per-step working set fits a small VMEM
    budget while keeping >= 2 grid steps (so v7x's two TensorCores both get
    work via the 'parallel' grid axis)."""
    best = 1
    for b in range(1, N + 1):
        if N % b:
            continue
        L = b * HW
        approx = L * (2 * Cin * 2          # bf16 x block (double-buffered)
                      + 9 * width * 2      # bf16/f32 im2col cols (bf16 bound)
                      + 3 * width * 4      # f32 h1/h2 + slack
                      + 3 * Cout * 4)      # f32 h3/y + out block (dbl-buf)
        if approx > budget_bytes:
            continue
        if N >= 2 and N // b < 2:
            continue
        best = b
    return best


def _tap_masks(H, W, B):
    """(8, B*H*W) bf16 {0,1} validity mask per non-center 3x3 tap.  Built
    from the intra-image position (pos % HW) so taps of lane-folded images
    never read across image boundaries.  Pure numpy -> trace-time constant."""
    q = np.arange(B * H * W) % (H * W)
    hh, ww = q // W, q % W
    rows = []
    for dy in (-1, 0, 1):
        for dx in (-1, 0, 1):
            if dy == 0 and dx == 0:
                continue
            ok = (hh + dy >= 0) & (hh + dy < H) & (ww + dx >= 0) & (ww + dx < W)
            rows.append(ok)
    return jnp.asarray(np.stack(rows).astype(np.float32), dtype=jnp.bfloat16)


def bottleneck_forward(x_nchw, params):
    """x_nchw: (N, Cin, H, W) f32/bf16; params = prepare_params(w1, w2, w3)."""
    w1_bf, w2f_bf, w3_bf = params
    N, Cin, H, W = x_nchw.shape
    width = w1_bf.shape[0]
    Cout = w3_bf.shape[0]
    HW = H * W

    assert Cin == Cout, "identity residual (downsample=None) requires Cin == Cout"
    assert HW % 128 == 0, "H*W must be a multiple of 128 for lane-dense tiles"
    # TODO(synk): pad HW up to a multiple of 128 (masking the pad lanes) to
    # support odd ResNet spatial sizes like 7x7 / 14x14.

    B = _choose_images_per_block(N, Cin, width, Cout, HW)
    L = B * HW

    # NCHW -> (N, Cin, H*W) bf16: channels on sublanes, spatial on lanes.
    # bf16 activations halve input HBM traffic; the matmuls consume bf16.
    x = x_nchw.reshape(N, Cin, HW).astype(jnp.bfloat16)
    masks = _tap_masks(H, W, B)          # fetched once (constant index_map)

    kernel = functools.partial(_bottleneck_kernel, W=W, HW=HW, B=B)
    # TODO(synk): for production ResNet shapes add a spatial row-strip grid
    # axis (1-row halo), single-buffer the weights (pipeline_mode=pl.Buffered(1))
    # and set vmem_limit_bytes so the strip + bf16 cols fit v7x's 64 MiB VMEM.
    out = pl.pallas_call(
        kernel,
        out_shape=jax.ShapeDtypeStruct((N, Cout, HW), x_nchw.dtype),
        grid_spec=pltpu.PrefetchScalarGridSpec(
            num_scalar_prefetch=0,
            grid=(N // B,),
            in_specs=[
                pl.BlockSpec((B, Cin, HW), lambda n: (n, 0, 0)),
                pl.BlockSpec((8, L), lambda n: (0, 0)),
                pl.BlockSpec((width, Cin), lambda n: (0, 0)),
                pl.BlockSpec((width, 9 * width), lambda n: (0, 0)),
                pl.BlockSpec((Cout, width), lambda n: (0, 0)),
            ],
            out_specs=pl.BlockSpec((B, Cout, HW), lambda n: (n, 0, 0)),
        ),
        compiler_params=pltpu.CompilerParams(
            dimension_semantics=("parallel",)),
    )(x, masks, w1_bf, w2f_bf, w3_bf)

    return out.reshape(N, Cout, H, W)


def bottleneck_reference(x_nchw, w1, w2, w3):
    """Plain-JAX (XLA conv, f32) reference with the PyTorch module semantics."""
    def gelu(v):
        return 0.5 * v * (1.0 + jax.lax.erf(v / SQRT2))

    dn = ('NCHW', 'OIHW', 'NCHW')
    h = gelu(jax.lax.conv_general_dilated(x_nchw, w1[:, :, None, None],
                                          (1, 1), 'VALID',
                                          dimension_numbers=dn))
    h = gelu(jax.lax.conv_general_dilated(h, w2, (1, 1), ((1, 1), (1, 1)),
                                          dimension_numbers=dn))
    h = gelu(jax.lax.conv_general_dilated(h, w3[:, :, None, None],
                                          (1, 1), 'VALID',
                                          dimension_numbers=dn))
    return gelu(h + x_nchw)


if __name__ == "__main__":
    key = jax.random.PRNGKey(0)
    kx, k1, k2, k3 = jax.random.split(key, 4)

    # Bottleneck(input_channel=16, output_channel=4, base_width=64, groups=1,
    #            stride=1, dilation=1, downsample=None)
    N, out_channel, expansion = 4, 4, 4
    Cin = out_channel * expansion      # residual add requires Cin == out_channel*4
    width = out_channel                # width = out_ch * (64 // 64) * 1
    Cout = out_channel * expansion
    H = W = 16

    # Deterministic synthetic parameters (bias=False convs).
    x = jax.random.normal(kx, (N, Cin, H, W), jnp.float32)
    w1 = 0.2 * jax.random.normal(k1, (width, Cin), jnp.float32)          # conv1
    w2 = 0.2 * jax.random.normal(k2, (width, width, 3, 3), jnp.float32)  # conv2
    w3 = 0.2 * jax.random.normal(k3, (Cout, width), jnp.float32)         # conv3

    params = prepare_params(w1, w2, w3)          # one-time weight prep
    fwd = jax.jit(bottleneck_forward)

    out = fwd(x, params)
    jax.block_until_ready(out)

    ref = bottleneck_reference(x, w1, w2, w3)
    err = float(jnp.max(jnp.abs(out - ref)))
    # bf16 activations / matmul operands (f32 accumulation) vs f32 XLA
    # reference -> relaxed tolerance; wiring bugs show up as O(0.5+) errors.
    assert err < 1e-1, f"max abs err {err}"
    print("KERNEL_OK")
</pallas_src>

<mosaic_0001>
module attributes {stable_mosaic.version = 11 : i64} {
  func.func @_bottleneck_kernel(%arg0: i32, %arg1: memref<2x16x256xbf16, #tpu.memory_space<vmem>>, %arg2: memref<8x512xbf16, #tpu.memory_space<vmem>>, %arg3: memref<4x16xbf16, #tpu.memory_space<vmem>>, %arg4: memref<4x36xbf16, #tpu.memory_space<vmem>>, %arg5: memref<16x4xbf16, #tpu.memory_space<vmem>>, %arg6: memref<2x16x256xf32, #tpu.memory_space<vmem>>) attributes {dimension_semantics = [#tpu.dimension_semantics<parallel>], iteration_bounds = array<i64: 2>, scalar_prefetch = 0 : i64, scratch_operands = 0 : i64, tpu.core_type = #tpu.core_type<tc>, window_params = [{transform_indices = @transform_0, window_bounds = array<i64: 2, 16, 256>}, {pipeline_mode = #tpu.pipeline_mode<synchronous>, transform_indices = @transform_1, window_bounds = array<i64: 8, 512>}, {pipeline_mode = #tpu.pipeline_mode<synchronous>, transform_indices = @transform_2, window_bounds = array<i64: 4, 16>}, {pipeline_mode = #tpu.pipeline_mode<synchronous>, transform_indices = @transform_3, window_bounds = array<i64: 4, 36>}, {pipeline_mode = #tpu.pipeline_mode<synchronous>, transform_indices = @transform_4, window_bounds = array<i64: 16, 4>}, {transform_indices = @transform_5, window_bounds = array<i64: 2, 16, 256>}]} {
    %c0 = arith.constant 0 : index
    %c0_0 = arith.constant 0 : index
    %c0_1 = arith.constant 0 : index
    %0 = vector.load %arg1[%c0, %c0_0, %c0_1] : memref<2x16x256xbf16, #tpu.memory_space<vmem>>, vector<1x16x256xbf16>
    %1 = vector.shape_cast %0 : vector<1x16x256xbf16> to vector<16x256xbf16>
    %c1 = arith.constant 1 : index
    %c0_2 = arith.constant 0 : index
    %c0_3 = arith.constant 0 : index
    %2 = vector.load %arg1[%c1, %c0_2, %c0_3] : memref<2x16x256xbf16, #tpu.memory_space<vmem>>, vector<1x16x256xbf16>
    %3 = vector.shape_cast %2 : vector<1x16x256xbf16> to vector<16x256xbf16>
    %4 = tpu.concatenate %1, %3 in 1 : vector<16x256xbf16>, vector<16x256xbf16> -> vector<16x512xbf16>
    %c0_4 = arith.constant 0 : index
    %c0_5 = arith.constant 0 : index
    %5 = vector.load %arg3[%c0_4, %c0_5] : memref<4x16xbf16, #tpu.memory_space<vmem>>, vector<4x16xbf16>
    %cst = arith.constant dense<0.000000e+00> : vector<4x512xf32>
    %6 = tpu.matmul %5, %4, %cst {dimension_numbers = #tpu.dot_dimension_numbers<[1], [0], [0], [1], [0, 0, 1, 1], [], []>} : vector<4x16xbf16>, vector<16x512xbf16>, vector<4x512xf32> -> vector<4x512xf32>
    %cst_6 = arith.constant 5.000000e-01 : f32
    %7 = vector.broadcast %cst_6 : f32 to vector<4x512xf32>
    %8 = arith.mulf %7, %6 : vector<4x512xf32>
    %cst_7 = arith.constant 1.41421354 : f32
    %9 = vector.broadcast %cst_7 : f32 to vector<4x512xf32>
    %10 = arith.divf %6, %9 : vector<4x512xf32>
    %11 = math.erf %10 : vector<4x512xf32>
    %cst_8 = arith.constant 1.000000e+00 : f32
    %12 = vector.broadcast %cst_8 : f32 to vector<4x512xf32>
    %13 = arith.addf %12, %11 : vector<4x512xf32>
    %14 = arith.mulf %8, %13 : vector<4x512xf32>
    %c0_9 = arith.constant 0 : index
    %c0_10 = arith.constant 0 : index
    %15 = vector.load %arg2[%c0_9, %c0_10] : memref<8x512xbf16, #tpu.memory_space<vmem>>, vector<8x512xbf16>
    %c17_i32 = arith.constant 17 : i32
    %16 = tpu.dynamic_rotate %14 by %c17_i32 dim 1 : vector<4x512xf32>, i32 -> vector<4x512xf32>
    %17 = vector.extract_strided_slice %15 {offsets = [0, 0], sizes = [1, 512], strides = [1, 1]} : vector<8x512xbf16> to vector<1x512xbf16>
    %18 = arith.extf %17 : vector<1x512xbf16> to vector<1x512xf32>
    %19 = vector.broadcast %18 : vector<1x512xf32> to vector<4x512xf32>
    %20 = arith.mulf %16, %19 : vector<4x512xf32>
    %c16_i32 = arith.constant 16 : i32
    %21 = tpu.dynamic_rotate %14 by %c16_i32 dim 1 : vector<4x512xf32>, i32 -> vector<4x512xf32>
    %22 = vector.extract_strided_slice %15 {offsets = [1, 0], sizes = [1, 512], strides = [1, 1]} : vector<8x512xbf16> to vector<1x512xbf16>
    %23 = arith.extf %22 : vector<1x512xbf16> to vector<1x512xf32>
    %24 = vector.broadcast %23 : vector<1x512xf32> to vector<4x512xf32>
    %25 = arith.mulf %21, %24 : vector<4x512xf32>
    %c15_i32 = arith.constant 15 : i32
    %26 = tpu.dynamic_rotate %14 by %c15_i32 dim 1 : vector<4x512xf32>, i32 -> vector<4x512xf32>
    %27 = vector.extract_strided_slice %15 {offsets = [2, 0], sizes = [1, 512], strides = [1, 1]} : vector<8x512xbf16> to vector<1x512xbf16>
    %28 = arith.extf %27 : vector<1x512xbf16> to vector<1x512xf32>
    %29 = vector.broadcast %28 : vector<1x512xf32> to vector<4x512xf32>
    %30 = arith.mulf %26, %29 : vector<4x512xf32>
    %c1_i32 = arith.constant 1 : i32
    %31 = tpu.dynamic_rotate %14 by %c1_i32 dim 1 : vector<4x512xf32>, i32 -> vector<4x512xf32>
    %32 = vector.extract_strided_slice %15 {offsets = [3, 0], sizes = [1, 512], strides = [1, 1]} : vector<8x512xbf16> to vector<1x512xbf16>
    %33 = arith.extf %32 : vector<1x512xbf16> to vector<1x512xf32>
    %34 = vector.broadcast %33 : vector<1x512xf32> to vector<4x512xf32>
    %35 = arith.mulf %31, %34 : vector<4x512xf32>
    %c511_i32 = arith.constant 511 : i32
    %36 = tpu.dynamic_rotate %14 by %c511_i32 dim 1 : vector<4x512xf32>, i32 -> vector<4x512xf32>
    %37 = vector.extract_strided_slice %15 {offsets = [4, 0], sizes = [1, 512], strides = [1, 1]} : vector<8x512xbf16> to vector<1x512xbf16>
    %38 = arith.extf %37 : vector<1x512xbf16> to vector<1x512xf32>
    %39 = vector.broadcast %38 : vector<1x512xf32> to vector<4x512xf32>
    %40 = arith.mulf %36, %39 : vector<4x512xf32>
    %c497_i32 = arith.constant 497 : i32
    %41 = tpu.dynamic_rotate %14 by %c497_i32 dim 1 : vector<4x512xf32>, i32 -> vector<4x512xf32>
    %42 = vector.extract_strided_slice %15 {offsets = [5, 0], sizes = [1, 512], strides = [1, 1]} : vector<8x512xbf16> to vector<1x512xbf16>
    %43 = arith.extf %42 : vector<1x512xbf16> to vector<1x512xf32>
    %44 = vector.broadcast %43 : vector<1x512xf32> to vector<4x512xf32>
    %45 = arith.mulf %41, %44 : vector<4x512xf32>
    %c496_i32 = arith.constant 496 : i32
    %46 = tpu.dynamic_rotate %14 by %c496_i32 dim 1 : vector<4x512xf32>, i32 -> vector<4x512xf32>
    %47 = vector.extract_strided_slice %15 {offsets = [6, 0], sizes = [1, 512], strides = [1, 1]} : vector<8x512xbf16> to vector<1x512xbf16>
    %48 = arith.extf %47 : vector<1x512xbf16> to vector<1x512xf32>
    %49 = vector.broadcast %48 : vector<1x512xf32> to vector<4x512xf32>
    %50 = arith.mulf %46, %49 : vector<4x512xf32>
    %c495_i32 = arith.constant 495 : i32
    %51 = tpu.dynamic_rotate %14 by %c495_i32 dim 1 : vector<4x512xf32>, i32 -> vector<4x512xf32>
    %52 = vector.extract_strided_slice %15 {offsets = [7, 0], sizes = [1, 512], strides = [1, 1]} : vector<8x512xbf16> to vector<1x512xbf16>
    %53 = arith.extf %52 : vector<1x512xbf16> to vector<1x512xf32>
    %54 = vector.broadcast %53 : vector<1x512xf32> to vector<4x512xf32>
    %55 = arith.mulf %51, %54 : vector<4x512xf32>
    %56 = tpu.concatenate %20, %25, %30, %35, %14, %40, %45, %50, %55 in 0 : vector<4x512xf32>, vector<4x512xf32>, vector<4x512xf32>, vector<4x512xf32>, vector<4x512xf32>, vector<4x512xf32>, vector<4x512xf32>, vector<4x512xf32>, vector<4x512xf32> -> vector<36x512xf32>
    %57 = arith.truncf %56 : vector<36x512xf32> to vector<36x512xbf16>
    %c0_11 = arith.constant 0 : index
    %c0_12 = arith.constant 0 : index
    %58 = vector.load %arg4[%c0_11, %c0_12] : memref<4x36xbf16, #tpu.memory_space<vmem>>, vector<4x36xbf16>
    %cst_13 = arith.constant dense<0.000000e+00> : vector<4x512xf32>
    %59 = tpu.matmul %58, %57, %cst_13 {dimension_numbers = #tpu.dot_dimension_numbers<[1], [0], [0], [1], [0, 0, 1, 1], [], []>} : vector<4x36xbf16>, vector<36x512xbf16>, vector<4x512xf32> -> vector<4x512xf32>
    %cst_14 = arith.constant 5.000000e-01 : f32
    %60 = vector.broadcast %cst_14 : f32 to vector<4x512xf32>
    %61 = arith.mulf %60, %59 : vector<4x512xf32>
    %cst_15 = arith.constant 1.41421354 : f32
    %62 = vector.broadcast %cst_15 : f32 to vector<4x512xf32>
    %63 = arith.divf %59, %62 : vector<4x512xf32>
    %64 = math.erf %63 : vector<4x512xf32>
    %cst_16 = arith.constant 1.000000e+00 : f32
    %65 = vector.broadcast %cst_16 : f32 to vector<4x512xf32>
    %66 = arith.addf %65, %64 : vector<4x512xf32>
    %67 = arith.mulf %61, %66 : vector<4x512xf32>
    %c0_17 = arith.constant 0 : index
    %c0_18 = arith.constant 0 : index
    %68 = vector.load %arg5[%c0_17, %c0_18] : memref<16x4xbf16, #tpu.memory_space<vmem>>, vector<16x4xbf16>
    %69 = arith.truncf %67 : vector<4x512xf32> to vector<4x512xbf16>
    %cst_19 = arith.constant dense<0.000000e+00> : vector<16x512xf32>
    %70 = tpu.matmul %68, %69, %cst_19 {dimension_numbers = #tpu.dot_dimension_numbers<[1], [0], [0], [1], [0, 0, 1, 1], [], []>} : vector<16x4xbf16>, vector<4x512xbf16>, vector<16x512xf32> -> vector<16x512xf32>
    %cst_20 = arith.constant 5.000000e-01 : f32
    %71 = vector.broadcast %cst_20 : f32 to vector<16x512xf32>
    %72 = arith.mulf %71, %70 : vector<16x512xf32>
    %cst_21 = arith.constant 1.41421354 : f32
    %73 = vector.broadcast %cst_21 : f32 to vector<16x512xf32>
    %74 = arith.divf %70, %73 : vector<16x512xf32>
    %75 = math.erf %74 : vector<16x512xf32>
    %cst_22 = arith.constant 1.000000e+00 : f32
    %76 = vector.broadcast %cst_22 : f32 to vector<16x512xf32>
    %77 = arith.addf %76, %75 : vector<16x512xf32>
    %78 = arith.mulf %72, %77 : vector<16x512xf32>
    %79 = arith.extf %4 : vector<16x512xbf16> to vector<16x512xf32>
    %80 = arith.addf %78, %79 : vector<16x512xf32>
    %cst_23 = arith.constant 5.000000e-01 : f32
    %81 = vector.broadcast %cst_23 : f32 to vector<16x512xf32>
    %82 = arith.mulf %81, %80 : vector<16x512xf32>
    %cst_24 = arith.constant 1.41421354 : f32
    %83 = vector.broadcast %cst_24 : f32 to vector<16x512xf32>
    %84 = arith.divf %80, %83 : vector<16x512xf32>
    %85 = math.erf %84 : vector<16x512xf32>
    %cst_25 = arith.constant 1.000000e+00 : f32
    %86 = vector.broadcast %cst_25 : f32 to vector<16x512xf32>
    %87 = arith.addf %86, %85 : vector<16x512xf32>
    %88 = arith.mulf %82, %87 : vector<16x512xf32>
    %89 = vector.extract_strided_slice %88 {offsets = [0, 0], sizes = [16, 256], strides = [1, 1]} : vector<16x512xf32> to vector<16x256xf32>
    %c0_26 = arith.constant 0 : index
    %c0_27 = arith.constant 0 : index
    %c0_28 = arith.constant 0 : index
    %90 = vector.load %arg6[%c0_26, %c0_27, %c0_28] : memref<2x16x256xf32, #tpu.memory_space<vmem>>, vector<1x16x256xf32>
    %91 = vector.shape_cast %90 : vector<1x16x256xf32> to vector<16x256xf32>
    %92 = vector.shape_cast %89 : vector<16x256xf32> to vector<1x16x256xf32>
    tpu.vector_store %arg6[%c0_26, %c0_27, %c0_28], %92 {strides = array<i32>} : memref<2x16x256xf32, #tpu.memory_space<vmem>>, vector<1x16x256xf32>,
    %93 = vector.extract_strided_slice %88 {offsets = [0, 256], sizes = [16, 256], strides = [1, 1]} : vector<16x512xf32> to vector<16x256xf32>
    %c1_29 = arith.constant 1 : index
    %c0_30 = arith.constant 0 : index
    %c0_31 = arith.constant 0 : index
    %94 = vector.load %arg6[%c1_29, %c0_30, %c0_31] : memref<2x16x256xf32, #tpu.memory_space<vmem>>, vector<1x16x256xf32>
    %95 = vector.shape_cast %94 : vector<1x16x256xf32> to vector<16x256xf32>
    %96 = vector.shape_cast %93 : vector<16x256xf32> to vector<1x16x256xf32>
    tpu.vector_store %arg6[%c1_29, %c0_30, %c0_31], %96 {strides = array<i32>} : memref<2x16x256xf32, #tpu.memory_space<vmem>>, vector<1x16x256xf32>,
    return
  }
  func.func @transform_0(%arg0: i32) -> (i32, i32, i32) {
    %c0_i32 = arith.constant 0 : i32
    %c0_i32_0 = arith.constant 0 : i32
    %c0_i32_1 = arith.constant 0 : i32
    return %arg0, %c0_i32, %c0_i32_0 : i32, i32, i32
  }
  func.func @transform_1(%arg0: i32) -> (i32, i32) {
    %c0_i32 = arith.constant 0 : i32
    %c0_i32_0 = arith.constant 0 : i32
    %c0_i32_1 = arith.constant 0 : i32
    return %c0_i32, %c0_i32_0 : i32, i32
  }
  func.func @transform_2(%arg0: i32) -> (i32, i32) {
    %c0_i32 = arith.constant 0 : i32
    %c0_i32_0 = arith.constant 0 : i32
    %c0_i32_1 = arith.constant 0 : i32
    return %c0_i32, %c0_i32_0 : i32, i32
  }
  func.func @transform_3(%arg0: i32) -> (i32, i32) {
    %c0_i32 = arith.constant 0 : i32
    %c0_i32_0 = arith.constant 0 : i32
    %c0_i32_1 = arith.constant 0 : i32
    return %c0_i32, %c0_i32_0 : i32, i32
  }
  func.func @transform_4(%arg0: i32) -> (i32, i32) {
    %c0_i32 = arith.constant 0 : i32
    %c0_i32_0 = arith.constant 0 : i32
    %c0_i32_1 = arith.constant 0 : i32
    return %c0_i32, %c0_i32_0 : i32, i32
  }
  func.func @transform_5(%arg0: i32) -> (i32, i32, i32) {
    %c0_i32 = arith.constant 0 : i32
    %c0_i32_0 = arith.constant 0 : i32
    %c0_i32_1 = arith.constant 0 : i32
    return %arg0, %c0_i32, %c0_i32_0 : i32, i32, i32
  }
}

</mosaic_0001>

<bundles_post_ra>
// kernel: bottleneck_forward.1
= control target key start
LH: loop header
LB: loop body
LE: loop exit
PB: predicated region body
PF: predicated region fallthrough
CT: control target
= control target key end

     0   :  { %s1267_s18 = smov 0   ;;  %s1681_s0 = inlined_call_operand.vmem [shape: bf16[4,16,256], index: 0, kind: input, shape index: {}]   ;;  %s1682_s1 = inlined_call_operand.vmem [shape: bf16[8,512], index: 1, kind: input, shape index: {}]   ;;  %s1683_s2 = inlined_call_operand.vmem [shape: bf16[4,16], index: 2, kind: input, shape index: {}]   ;;  %s1684_s3 = inlined_call_operand.vmem [shape: bf16[4,36], index: 3, kind: input, shape index: {}]   ;;  %s1685_s4 = inlined_call_operand.vmem [shape: bf16[16,4], index: 4, kind: input, shape index: {}]   ;;  %s1686_s5 = inlined_call_operand.vmem [shape: f32[4,16,256], index: 5, kind: output, shape index: {}]  }
   0x1 LB: > { %s1112_s19 = sadd.s32 4294967295, %s1226_s18   ;;  %p1116_p0 = scmp.ge.s32.totalorder %s1226_s18, 1  ;;  %s1226_s18 = sphi %s1267_s18, %s15_s18  }
   0x2   : > { %p189_p1 = scmp.lt.s32.totalorder %s1226_s18, 3 }
   0x4   : > { %p190_p2 = pnand %p1116_p0, %p189_p1 }
   0x5   : > { %s1117_s20 = sshll.u32 (!%p190_p2), %s1112_s19, 1  ;;  %v1687_v0 = vmov (!%p190_p2), 0   ;;  %v259_v5 = vld [vmem:[%s1683_s2] sm:$0x3] (!%p190_p2)  ;;  %vm260_vm0 = vcmask (!%p190_p2), 130048   ;;  %s1229_s27 = smov (!%p190_p2), 1   ;;  %v377_v42 = vlaneseq (!%p190_p2) }
   0x6   : > { %193 = sbr.rel (%p190_p2) target bundleno = 928 (0x3a0), region = 40  ;;  %p220_p3 = scmp.lt.s32.totalorder (!%p190_p2), %s1117_s20, 3  ;;  %296 = vmatprep.mubr.bf16.mxu0 (!%p190_p2), %v1687_v0  ;;  %337 = vmatprep.mubr.bf16.mxu1 (!%p190_p2), %v1687_v0  ;;  %v367_v46 = vld [vmem:[%s1682_s1] sm:$0xff] (!%p190_p2)  ;;  %v368_v47 = vld [vmem:[%s1682_s1 + $0x8] sm:$0xff] (!%p190_p2)  ;;  %vm687_vm5 = vcmask (!%p190_p2), 1043456   ;;  %vm721_vm10 = vcmask (!%p190_p2), 1041408  }
   0x7   : > { %s1230_s28 = smov (!%p190_p2), 16   ;;  %s1231_s29 = smov (!%p190_p2), 127   ;;  %v389_v44 = vshrl.u32 (!%p190_p2), %v377_v42, 7  ;;  %v1376_v48 = vand.u32 (!%p190_p2), 127, %v377_v42  ;;  %v1378_v49 = vunpack.c.h.bf16 (!%p190_p2), %v367_v46  ;;  %v1382_v53 = vunpack.c.l.bf16 (!%p190_p2), %v368_v47 }
   0x8   : > { %s1232_s30 = smov (!%p190_p2), 112   ;;  %s1233_s6 = smov (!%p190_p2), 113   ;;  %v1384_v54 = vunpack.c.l.bf16 (!%p190_p2), %v367_v46  ;;  %v1386_v55 = vunpack.c.h.bf16 (!%p190_p2), %v368_v47  ;;  %vm717_vm11 = vcmask (!%p190_p2), 293888   ;;  %vm847_vm12 = vcmask (!%p190_p2), 31744  }
   0x9   : > { %s1234_s7 = smov (!%p190_p2), 17   ;;  %s1235_s8 = smov (!%p190_p2), 15   ;;  %v489_v50 = vsub.s32 (!%p190_p2), 3, %v389_v44  ;;  %v1388_v56 = vsub.s32 (!%p190_p2), 1, %v389_v44  ;;  %v1390_v57 = vsub.s32 (!%p190_p2), 0, %v389_v44  ;;  %v1392_v58 = vsub.s32 (!%p190_p2), 2, %v389_v44 }
   0xa   : > { %s1236_s9 = smov (!%p190_p2), 111   ;;  %vm482_vm1 = vcmp.lt.s32.totalorder (!%p190_p2), %v1376_v48, 1  ;;  %vm416_vm2 = vcmp.lt.s32.totalorder (!%p190_p2), %v1376_v48, 16  ;;  %vm379_vm3 = vcmp.lt.s32.totalorder (!%p190_p2), %v1376_v48, 17  ;;  %vm449_vm4 = vcmp.lt.s32.totalorder (!%p190_p2), %v1376_v48, 15 }
   0xb   : > { %v494_v59 = vrot.slane (!%p190_p2), %v1378_v49, %v489_v50  ;;  %v498_v62 = vrot.slane (!%p190_p2), %v1382_v53, %v489_v50  ;;  %v424_v63 = vrot.slane (!%p190_p2), %v1384_v54, %v1388_v56  ;;  %vm515_vm6 = vcmp.lt.s32.totalorder (!%p190_p2), %v1376_v48, 127 }
   0xc   : > { %vm581_vm7 = vcmp.lt.s32.totalorder (!%p190_p2), %v1376_v48, 112  ;;  %vm548_vm8 = vcmp.lt.s32.totalorder (!%p190_p2), %v1376_v48, 113  ;;  %vm614_vm9 = vcmp.lt.s32.totalorder (!%p190_p2), %v1376_v48, 111 }
   0xd   : > { %s1703_s20 = smov (!%p220_p3, %s1117_s20), 3 }
   0xe   : > { %s1146_s21 = sshll.u32 %s1703_s20, 4  ;;  %s1147_s19 = sshll.u32 %s1703_s20, 5 }
   0xf   : > { %s224_s24 = scalar_lea.vmem %s1681_s0, %s1146_s21  ;;  %s1668_s23 = scalar_lea.vmem %s1686_s5, %s1147_s19 }
  0x10   : > { %v1283_v1 = vld [vmem:[%s224_s24 + $0x4] ss:$8 sps:$4 sm:$0xff]   ;;  %v1285_v2 = vld [vmem:[%s224_s24 + $0x14] ss:$8 sps:$4 sm:$0xff]   ;;  %v1288_v3 = vld [vmem:[%s224_s24] ss:$8 sps:$4 sm:$0xff]  }
  0x11   : > { %264 = vmatprep.subr.bf16.mxu0 %v1283_v1  ;;  %v1290_v4 = vld [vmem:[%s224_s24 + $0x10] ss:$8 sps:$4 sm:$0xff]   ;;  %305 = vmatprep.subr.bf16.mxu1 %v1285_v2 }
  0x12   : > { %265 = vmatpush1.bf16.msra.mxu0 %v1288_v3  ;;  %306 = vmatpush1.bf16.msra.mxu1 %v1290_v4 }
  0x15   : > { %1129 = vmatmul.mubr.msk.bf16.vlgmr.msra.gmra.mrb[0].mxu0 %vm260_vm0, %v259_v5  ;;  %1130 = vmatmul.mubr.msk.bf16.vlgmr.msra.gmra.mrb[0].mxu1 %vm260_vm0, %v259_v5  ;;  %v436_v5 = vrot.slane %v1386_v55, %v1388_v56 }
  0x16   : > { %766 = vmatprep.mubr.bf16.mxu0 %v1687_v0  ;;  %807 = vmatprep.mubr.bf16.mxu1 %v1687_v0 }
  0xe8   : > { %v298_v6 = vpop.f32.mrb[0].mxu0  ;;  %v339_v7 = vpop.f32.mrb[0].mxu1 }
  0xe9   : > { %v351_v8 = vmul.f32 0.70710677, %v298_v6  ;;  %v353_v9 = vmul.f32 0.70710677, %v339_v7  ;;  %v300_v10 = vpop.f32.mrb[1].mxu0  ;;  %v341_v11 = vpop.f32.mrb[1].mxu1 }
  0xea   : > { %v302_v12 = vpop.f32.mrb[2].mxu0  ;;  %v343_v13 = vpop.f32.mrb[2].mxu1  ;;  %v352_v16 = vmul.f32 0.70710677, %v300_v10  ;;  %v346_v19 = vmul.f32 0.5, %v298_v6  ;;  %v348_v24 = vmul.f32 0.5, %v339_v7  ;;  %v490_v6 = vrot.slane %v1384_v54, %v489_v50 }
  0xeb   : > { %1172 = verf.f32 %v351_v8  ;;  %v303_v14 = vpop.f32.mrb[3].mxu0  ;;  %v344_v15 = vpop.f32.mrb[3].mxu1  ;;  %v354_v21 = vmul.f32 0.70710677, %v341_v11  ;;  %v347_v29 = vmul.f32 0.5, %v300_v10  ;;  %v349_v32 = vmul.f32 0.5, %v341_v11 }
  0xec   : > { %1174 = verf.f32 %v353_v9  ;;  %v502_v7 = vrot.slane %v1386_v55, %v489_v50  ;;  %v1407_v8 = vsub.s32 4, %v389_v44  ;;  %v395_v9 = vrot.slane %v1378_v49, %v1390_v57 }
  0xed   : > { %1176 = verf.f32 %v352_v16  ;;  %v399_v10 = vrot.slane %v1382_v53, %v1390_v57  ;;  %v461_v11 = vrot.slane %v1378_v49, %v1392_v58  ;;  %v465_v14 = vrot.slane %v1382_v53, %v1392_v58 }
  0xee   : > { %1178 = verf.f32 %v354_v21  ;;  %v391_v15 = vrot.slane %v1384_v54, %v1390_v57  ;;  %v403_v16 = vrot.slane %v1386_v55, %v1390_v57  ;;  %v432_v21 = vrot.slane %v1382_v53, %v1388_v56 }
  0xf5   : > { %v1173_v17 = vpop.eup %1172 }
  0xf6   : > { %v1175_v18 = vpop.eup %1174  ;;  %v359_v20 = vadd.f32 1.0, %v1173_v17  ;;  %v1424_v17 = vsub.s32 6, %v389_v44 }
  0xf7   : > { %v361_v23 = vadd.f32 1.0, %v1175_v18  ;;  %v1177_v26 = vpop.eup %1176  ;;  %v457_v18 = vrot.slane %v1384_v54, %v1392_v58 }
  0xf8   : > { %v1300_v22 = vmul.f32 %v359_v20, %v346_v19  ;;  %v360_v27 = vadd.f32 1.0, %v1177_v26  ;;  %v1179_v28 = vpop.eup %1178  ;;  %v469_v19 = vrot.slane %v1386_v55, %v1392_v58  ;;  %v428_v20 = vrot.slane %v1378_v49, %v1388_v56 }
  0xf9   : > { %v1306_v25 = vmul.f32 %v361_v23, %v348_v24  ;;  %v362_v31 = vadd.f32 1.0, %v1179_v28  ;;  %v531_v23 = vrot.slane %v1382_v53, %v1407_v8 }
  0xfa   : > { %474 = vrot.lane.b32.xlu1 %v1300_v22, %s1229_s27  ;;  %408 = vrot.lane.b32.xlu0 %v1300_v22, %s1230_s28  ;;  %v1318_v30 = vmul.f32 %v360_v27, %v347_v29  ;;  %v1440_v27 = vsub.s32 5, %v389_v44 }
  0xfb   : > { %v1323_v33 = vmul.f32 %v362_v31, %v349_v32 }
  0xfe   : > { %511 = vrot.lane.b32.xlu1 %v1306_v25, %s1231_s29  ;;  %412 = vrot.lane.b32.xlu0 %v1306_v25, %s1230_s28 }
 0x102   : > { %577 = vrot.lane.b32.xlu1 %v1306_v25, %s1232_s30  ;;  %478 = vrot.lane.b32.xlu0 %v1306_v25, %s1229_s27 }
 0x106   : > { %544 = vrot.lane.b32.xlu1 %v1306_v25, %s1233_s6  ;;  %369 = vrot.lane.b32.xlu0 %v1300_v22, %s1234_s7 }
 0x10a   : > { %441 = vrot.lane.b32.xlu0 %v1300_v22, %s1235_s8  ;;  %476 = vrot.lane.b32.xlu1 %v1318_v30, %s1229_s27 }
 0x10e   : > { %373 = vrot.lane.b32.xlu0 %v1306_v25, %s1234_s7  ;;  %414 = vrot.lane.b32.xlu1 %v1323_v33, %s1230_s28 }
 0x112   : > { %445 = vrot.lane.b32.xlu0 %v1306_v25, %s1235_s8  ;;  %480 = vrot.lane.b32.xlu1 %v1323_v33, %s1229_s27 }
 0x116   : > { %507 = vrot.lane.b32.xlu0 %v1300_v22, %s1231_s29  ;;  %371 = vrot.lane.b32.xlu1 %v1318_v30, %s1234_s7 }
 0x11a   : > { %573 = vrot.lane.b32.xlu0 %v1300_v22, %s1232_s30  ;;  %443 = vrot.lane.b32.xlu1 %v1318_v30, %s1235_s8 }
 0x11e   : > { %540 = vrot.lane.b32.xlu0 %v1300_v22, %s1233_s6  ;;  %375 = vrot.lane.b32.xlu1 %v1323_v33, %s1234_s7 }
 0x122   : > { %447 = vrot.lane.b32.xlu1 %v1323_v33, %s1235_s8  ;;  %410 = vrot.lane.b32.xlu0 %v1318_v30, %s1230_s28 }
 0x126   : > { %513 = vrot.lane.b32.xlu1 %v1323_v33, %s1231_s29  ;;  %509 = vrot.lane.b32.xlu0 %v1318_v30, %s1231_s29 }
 0x12a   : > { %579 = vrot.lane.b32.xlu1 %v1323_v33, %s1232_s30  ;;  %575 = vrot.lane.b32.xlu0 %v1318_v30, %s1232_s30 }
 0x12e   : > { %546 = vrot.lane.b32.xlu1 %v1323_v33, %s1233_s6  ;;  %542 = vrot.lane.b32.xlu0 %v1318_v30, %s1233_s6 }
 0x132   : > { %608 = vrot.lane.b32.xlu1 %v1318_v30, %s1236_s9  ;;  %606 = vrot.lane.b32.xlu0 %v1300_v22, %s1236_s9 }
 0x136   : > { %612 = vrot.lane.b32.xlu1 %v1323_v33, %s1236_s9  ;;  %610 = vrot.lane.b32.xlu0 %v1306_v25, %s1236_s9 }
 0x16c   : > { %v475_v34 = vpop.permute.xlu1 %474  ;;  %v1356_v35 = vpop.permute.xlu0 %408 }
 0x170   : > { %v1358_v36 = vpop.permute.xlu1 %511  ;;  %v1360_v37 = vpop.permute.xlu0 %412 }
 0x174   : > { %v1362_v38 = vpop.permute.xlu1 %577  ;;  %v479_v39 = vpop.permute.xlu0 %478 }
 0x178   : > { %v1364_v40 = vpop.permute.xlu1 %544  ;;  %v1366_v41 = vpop.permute.xlu0 %369 }
 0x17c   : > { %v1368_v43 = vpop.permute.xlu0 %441  ;;  %v477_v45 = vpop.permute.xlu1 %476 }
 0x17d   : > { %v484_v28 = vsel %vm482_vm1, %v477_v45, %v479_v39  ;;  %v485_v29 = vsel %vm482_vm1, %v475_v34, %v477_v45 }
 0x17e   : > { %v505_v0 = vmul.f32 %v498_v62, %v484_v28 }
 0x180   : > { %v1380_v51 = vpop.permute.xlu0 %373  ;;  %v415_v52 = vpop.permute.xlu1 %414 }
 0x181   : > { %v417_v31 = vsel %vm416_vm2, %v1360_v37, %v415_v52  ;;  %v420_v32 = vsel %vm416_vm2, %v415_v52, %v1356_v35 }
 0x182   : > { %v1470_v24 = vmul.f32 %v424_v63, %v420_v32  ;;  %v440_v26 = vmul.f32 %v436_v5, %v417_v31 }
 0x184   : > { %v1396_v60 = vpop.permute.xlu0 %445  ;;  %v481_v61 = vpop.permute.xlu1 %480 }
 0x185   : > { %v483_v42 = vsel %vm482_vm1, %v479_v39, %v481_v61  ;;  %v486_v46 = vsel %vm482_vm1, %v481_v61, %v475_v34  ;;  %v1468_v34 = vsub.s32 7, %v389_v44  ;;  %v504_v61 = vmul.f32 %v494_v59, %v485_v29 }
 0x186   : > { %v503_v45 = vmul.f32 %v490_v6, %v486_v46  ;;  %v506_v56 = vmul.f32 %v502_v7, %v483_v42  ;;  %v657_v42 = vrot.slane %v505_v0, 4  ;;  %v643_v46 = vrot.slane %v1470_v24, 4 }
 0x187   : > { %v634_v31 = vrot.slane %v1386_v55, %v1468_v34  ;;  %v656_v32 = vrot.slane %v504_v61, 4 }
 0x188   : > { %v1416_v12 = vpop.permute.xlu0 %507  ;;  %v372_v13 = vpop.permute.xlu1 %371  ;;  %v655_v6 = vrot.slane %v503_v45, 4  ;;  %v658_v5 = vrot.slane %v506_v56, 4 }
 0x189   : > { %v382_v7 = vsel %vm379_vm3, %v1366_v41, %v372_v13  ;;  %v381_v39 = vsel %vm379_vm3, %v372_v13, %v1380_v51 }
 0x18a   : > { %v405_v29 = vmul.f32 %v395_v9, %v382_v7 }
 0x18c   : > { %v1456_v47 = vpop.permute.xlu0 %573  ;;  %v444_v50 = vpop.permute.xlu1 %443 }
 0x18d   : > { %v451_v44 = vsel %vm449_vm4, %v444_v50, %v1396_v60  ;;  %v452_v59 = vsel %vm449_vm4, %v1368_v43, %v444_v50  ;;  %v646_v50 = vrot.slane %v440_v26, 4 }
 0x18e   : > { %v471_v52 = vmul.f32 %v461_v11, %v452_v59  ;;  %v472_v58 = vmul.f32 %v465_v14, %v451_v44 }
 0x190   : > { %v1483_v62 = vpop.permute.xlu0 %540  ;;  %v376_v63 = vpop.permute.xlu1 %375  ;;  %v693_v56 = vsel %vm687_vm5, %v471_v52, %v656_v32 }
 0x191   : > { %v380_v28 = vsel %vm379_vm3, %v1380_v51, %v376_v63  ;;  %v383_v0 = vsel %vm379_vm3, %v376_v63, %v1366_v41  ;;  %v1689_v63 = vrot.slane %v1384_v54, %v1407_v8 }
 0x192   : > { %v407_v24 = vmul.f32 %v403_v16, %v380_v28 }
 0x194   : > { %v448_v26 = vpop.permute.xlu1 %447  ;;  %v411_v61 = vpop.permute.xlu0 %410 }
 0x195   : > { %v450_v11 = vsel %vm449_vm4, %v1396_v60, %v448_v26  ;;  %v453_v14 = vsel %vm449_vm4, %v448_v26, %v1368_v43  ;;  %v418_v51 = vsel %vm416_vm2, %v411_v61, %v1360_v37  ;;  %v419_v9 = vsel %vm416_vm2, %v1356_v35, %v411_v61 }
 0x196   : > { %v470_v41 = vmul.f32 %v457_v18, %v453_v14  ;;  %v473_v13 = vmul.f32 %v469_v19, %v450_v11  ;;  %v438_v16 = vmul.f32 %v428_v20, %v419_v9  ;;  %v439_v45 = vmul.f32 %v432_v21, %v418_v51 }
 0x197   : > { %v406_v60 = vmul.f32 %v399_v10, %v381_v39  ;;  %v694_v43 = vsel %vm687_vm5, %v472_v58, %v657_v42  ;;  %v404_v37 = vmul.f32 %v391_v15, %v383_v0  ;;  %v691_v20 = vsel %vm687_vm5, %v407_v24, %v646_v50 }
 0x198   : > { %v644_v44 = vrot.slane %v438_v16, 4  ;;  %v645_v35 = vrot.slane %v439_v45, 4  ;;  %v514_v18 = vpop.permute.xlu1 %513  ;;  %v510_v19 = vpop.permute.xlu0 %509  ;;  %v695_v21 = vsel %vm687_vm5, %v473_v13, %v658_v5  ;;  %v692_v52 = vsel %vm687_vm5, %v470_v41, %v655_v6 }
 0x199   : > { %v516_v10 = vsel %vm515_vm6, %v1358_v36, %v514_v18  ;;  %v519_v58 = vsel %vm515_vm6, %v514_v18, %v1416_v12  ;;  %v517_v57 = vsel %vm515_vm6, %v510_v19, %v1358_v36  ;;  %v518_v15 = vsel %vm515_vm6, %v1416_v12, %v510_v19 }
 0x19a   : > { %v690_v39 = vsel %vm687_vm5, %v406_v60, %v645_v35  ;;  %v538_v59 = vmul.f32 %v531_v23, %v516_v10  ;;  %v536_v5 = vmul.f32 %v1689_v63, %v518_v15  ;;  %v1690_v36 = vrot.slane %v1386_v55, %v1407_v8 }
 0x19b   : > { %v707_v28 = vpack.c.bf16 %v695_v21, %v691_v20  ;;  %v689_v12 = vsel %vm687_vm5, %v405_v29, %v644_v44  ;;  %v706_v6 = vpack.c.bf16 %v694_v43, %v690_v39  ;;  %v1691_v42 = vrot.slane %v1378_v49, %v1407_v8 }
 0x19c   : > { %v539_v7 = vmul.f32 %v1690_v36, %v519_v58  ;;  %v669_v32 = vrot.slane %v538_v59, 4  ;;  %v667_v23 = vrot.slane %v536_v5, 4  ;;  %v580_v0 = vpop.permute.xlu1 %579  ;;  %v576_v24 = vpop.permute.xlu0 %575  ;;  %v705_v26 = vpack.c.bf16 %v693_v56, %v689_v12 }
 0x19d   : > { %v537_v50 = vmul.f32 %v1691_v42, %v517_v57  ;;  %775 = vmatprep.subr.bf16.mxu1 %v707_v28  ;;  %v582_v61 = vsel %vm581_vm7, %v1362_v38, %v580_v0  ;;  %v585_v11 = vsel %vm581_vm7, %v580_v0, %v1456_v47  ;;  %v583_v29 = vsel %vm581_vm7, %v576_v24, %v1362_v38 }
 0x19e   : > { %v626_v8 = vrot.slane %v1378_v49, %v1468_v34  ;;  %v688_v14 = vsel %vm687_vm5, %v404_v37, %v643_v46  ;;  %v1692_v51 = vrot.slane %v1382_v53, %v1424_v17  ;;  %v1693_v41 = vrot.slane %v1386_v55, %v1424_v17  ;;  %734 = vmatprep.subr.bf16.mxu0 %v705_v26 }
 0x19f   : > { %v630_v16 = vrot.slane %v1382_v53, %v1468_v34  ;;  %v670_v45 = vrot.slane %v539_v7, 4  ;;  %v584_v38 = vsel %vm581_vm7, %v1456_v47, %v576_v24  ;;  %v1694_v46 = vrot.slane %v1378_v49, %v1424_v17  ;;  %776 = vmatpush1.bf16.msra.mxu1 %v706_v6 }
 0x1a0   : > { %v604_v9 = vmul.f32 %v1692_v51, %v582_v61  ;;  %v605_v13 = vmul.f32 %v1693_v41, %v585_v11  ;;  %v704_v43 = vpack.c.bf16 %v692_v52, %v688_v14  ;;  %v698_v37 = vsel %vm687_vm5, %v1306_v25, %v669_v32  ;;  %v547_v19 = vpop.permute.xlu1 %546  ;;  %v543_v20 = vpop.permute.xlu0 %542 }
 0x1a1   : > { %v603_v60 = vmul.f32 %v1694_v46, %v583_v29  ;;  %v668_v56 = vrot.slane %v537_v50, 4  ;;  %v696_v44 = vsel %vm687_vm5, %v1300_v22, %v667_v23  ;;  %v1695_v35 = vrot.slane %v1384_v54, %v1424_v17 }
 0x1a2   : > { %v681_v47 = vrot.slane %v604_v9, 4  ;;  %735 = vmatpush1.bf16.msra.mxu0 %v704_v43  ;;  %v549_v21 = vsel %vm548_vm8, %v1364_v40, %v547_v19  ;;  %v552_v25 = vsel %vm548_vm8, %v547_v19, %v1483_v62  ;;  %v550_v22 = vsel %vm548_vm8, %v543_v20, %v1364_v40 }
 0x1a3   : > { %v602_v18 = vmul.f32 %v1695_v35, %v584_v38  ;;  %v682_v10 = vrot.slane %v605_v13, 4  ;;  %v1696_v17 = vrot.slane %v1382_v53, %v1440_v27  ;;  %v1697_v57 = vrot.slane %v1386_v55, %v1440_v27  ;;  %v716_v55 = vld [vmem:[%s1684_s3] sm:$0x3] }
 0x1a4   : > { %v551_v52 = vsel %vm548_vm8, %v1483_v62, %v543_v20  ;;  %v680_v59 = vrot.slane %v603_v60, 4  ;;  %v1698_v63 = vrot.slane %v1384_v54, %v1440_v27  ;;  %v1699_v40 = vrot.slane %v1378_v49, %v1440_v27  ;;  %v609_v7 = vpop.permute.xlu1 %608  ;;  %v607_v28 = vpop.permute.xlu0 %606 }
 0x1a5   : > { %v571_v58 = vmul.f32 %v1696_v17, %v549_v21  ;;  %v572_v15 = vmul.f32 %v1697_v57, %v552_v25  ;;  %v679_v39 = vrot.slane %v602_v18, 4  ;;  %v697_v12 = vsel %vm687_vm5, %v1318_v30, %v668_v56 }
 0x1a6   : > { %v569_v5 = vmul.f32 %v1698_v63, %v551_v52  ;;  %v570_v36 = vmul.f32 %v1699_v40, %v550_v22  ;;  %v699_v62 = vsel %vm687_vm5, %v1323_v33, %v670_v45  ;;  %v617_v42 = vsel %vm614_vm9, %v607_v28, %v609_v7 }
 0x1a7   : > { %v702_v53 = vsel %vm687_vm5, %v571_v58, %v681_v47  ;;  %v703_v6 = vsel %vm687_vm5, %v572_v15, %v682_v10  ;;  %v1700_v50 = vrot.slane %v1384_v54, %v1468_v34  ;;  %v1701_v34 = vmov 0  }
 0x1a8   : > { %v700_v32 = vsel %vm687_vm5, %v569_v5, %v679_v39  ;;  %v701_v49 = vsel %vm687_vm5, %v570_v36, %v680_v59  ;;  %v711_v27 = vpack.c.bf16 %v703_v6, %v699_v62  ;;  %v710_v30 = vpack.c.bf16 %v702_v53, %v698_v37  ;;  %v613_v33 = vpop.permute.xlu1 %612  ;;  %v611_v26 = vpop.permute.xlu0 %610  ;;  %v1171_v6 = vld [vmem:[%s1685_s4] sm:$0xff]  }
 0x1a9   : > { %v635_v23 = vmul.f32 %v1700_v50, %v617_v42  ;;  %v709_v0 = vpack.c.bf16 %v701_v49, %v697_v12  ;;  %v708_v24 = vpack.c.bf16 %v700_v32, %v696_v44  ;;  %v618_v61 = vsel %vm614_vm9, %v613_v33, %v607_v28 }
 0x1aa   : > { %777 = vmatprep.subr.bf16.mxu1 %v711_v27  ;;  %v615_v11 = vsel %vm614_vm9, %v611_v26, %v613_v33  ;;  %v616_v29 = vsel %vm614_vm9, %v609_v7, %v611_v26  ;;  %v638_v14 = vmul.f32 %v634_v31, %v618_v61 }
 0x1ab   : > { %736 = vmatprep.subr.bf16.mxu0 %v709_v0  ;;  %778 = vmatpush1.bf16.msra.mxu1 %v710_v30  ;;  %v712_v54 = vpack.c.bf16 %v635_v23, %v635_v23  ;;  %v636_v51 = vmul.f32 %v626_v8, %v616_v29  ;;  %v637_v9 = vmul.f32 %v630_v16, %v615_v11 }
 0x1ac   : > { %737 = vmatpush1.bf16.msra.mxu0 %v708_v24  ;;  %v715_v41 = vpack.c.bf16 %v638_v14, %v638_v14 }
 0x1ad   : > { %v713_v13 = vpack.c.bf16 %v636_v51, %v636_v51  ;;  %v714_v45 = vpack.c.bf16 %v637_v9, %v637_v9  ;;  %v723_v38 = vsel %vm721_vm10, %v712_v54, 0 }
 0x1ae   : > { %1133 = vmatprep.subr.msk.bf16.mxu1 %vm721_vm10, %v715_v41 }
 0x1af   : > { %1131 = vmatprep.subr.msk.bf16.mxu0 %vm721_vm10, %v713_v13  ;;  %v729_v48 = vsel %vm721_vm10, %v714_v45, 0  ;;  %v989_v45 = vunpack.c.l.bf16 %v1288_v3 }
 0x1b0   : > { %739 = vmatpush1.bf16.msra.mxu0 %v723_v38  ;;  %780 = vmatpush1.bf16.msra.mxu1 %v729_v48  ;;  %v991_v38 = vunpack.c.l.bf16 %v1290_v4 }
 0x1b3   : > { %1132 = vmatmul.mubr.msk.bf16.vlgmr.msra.gmra.mrb[4].mxu0 %vm717_vm11, %v716_v55  ;;  %1134 = vmatmul.mubr.msk.bf16.vlgmr.msra.gmra.mrb[4].mxu1 %vm717_vm11, %v716_v55 }
 0x1b4   : > { %895 = vmatprep.mubr.bf16.mxu0 %v1701_v34  ;;  %938 = vmatprep.mubr.bf16.mxu1 %v1701_v34 }
 0x286   : > { %v768_v31 = vpop.f32.mrb[4].mxu0  ;;  %v809_v8 = vpop.f32.mrb[4].mxu1 }
 0x287   : > { %v820_v16 = vmul.f32 0.70710677, %v768_v31  ;;  %v822_v46 = vmul.f32 0.70710677, %v809_v8  ;;  %v770_v60 = vpop.f32.mrb[5].mxu0  ;;  %v811_v43 = vpop.f32.mrb[5].mxu1 }
 0x288   : > { %v821_v37 = vmul.f32 0.70710677, %v770_v60  ;;  %v772_v56 = vpop.f32.mrb[6].mxu0  ;;  %v813_v44 = vpop.f32.mrb[6].mxu1  ;;  %v823_v35 = vmul.f32 0.70710677, %v811_v43 }
 0x289   : > { %1180 = verf.f32 %v820_v16  ;;  %v773_v18 = vpop.f32.mrb[7].mxu0  ;;  %v814_v19 = vpop.f32.mrb[7].mxu1  ;;  %v816_v21 = vmul.f32 0.5, %v768_v31  ;;  %v818_v10 = vmul.f32 0.5, %v809_v8  ;;  %v817_v15 = vmul.f32 0.5, %v770_v60 }
 0x28a   : > { %1182 = verf.f32 %v822_v46  ;;  %v819_v59 = vmul.f32 0.5, %v811_v43  ;;  %v990_v31 = vunpack.c.l.bf16 %v1283_v1  ;;  %v992_v8 = vunpack.c.l.bf16 %v1285_v2 }
 0x28b   : > { %1184 = verf.f32 %v821_v37  ;;  %v993_v37 = vunpack.c.h.bf16 %v1288_v3  ;;  %v995_v19 = vunpack.c.h.bf16 %v1290_v4 }
 0x28c   : > { %1186 = verf.f32 %v823_v35 }
 0x293   : > { %v1181_v20 = vpop.eup %1180 }
 0x294   : > { %v1183_v47 = vpop.eup %1182  ;;  %v828_v25 = vadd.f32 1.0, %v1181_v20 }
 0x295   : > { %v1185_v22 = vpop.eup %1184  ;;  %v830_v17 = vadd.f32 1.0, %v1183_v47 }
 0x296   : > { %v1187_v58 = vpop.eup %1186  ;;  %v832_v57 = vmul.f32 %v828_v25, %v816_v21  ;;  %v829_v52 = vadd.f32 1.0, %v1185_v22 }
 0x297   : > { %v834_v39 = vmul.f32 %v830_v17, %v818_v10  ;;  %v831_v63 = vadd.f32 1.0, %v1187_v58 }
 0x298   : > { %v838_v5 = vpack.c.bf16 %v832_v57, %v832_v57  ;;  %v833_v40 = vmul.f32 %v829_v52, %v817_v15 }
 0x299   : > { %v840_v36 = vpack.c.bf16 %v834_v39, %v834_v39  ;;  %v835_v53 = vmul.f32 %v831_v63, %v819_v59 }
 0x29a   : > { %v839_v7 = vpack.c.bf16 %v833_v40, %v833_v40  ;;  %v852_v28 = vsel %vm721_vm10, %v838_v5, 0 }
 0x29b   : > { %v841_v12 = vpack.c.bf16 %v835_v53, %v835_v53  ;;  %v858_v62 = vsel %vm721_vm10, %v840_v36, 0  ;;  %v994_v53 = vunpack.c.h.bf16 %v1283_v1 }
 0x29c   : > { %1136 = vmatprep.subr.msk.bf16.mxu0 %vm721_vm10, %v839_v7 }
 0x29d   : > { %1138 = vmatprep.subr.msk.bf16.mxu1 %vm721_vm10, %v841_v12  ;;  %864 = vmatpush1.bf16.msra.mxu0 %v852_v28  ;;  %v996_v12 = vunpack.c.h.bf16 %v1285_v2 }
 0x29e   : > { %907 = vmatpush1.bf16.msra.mxu1 %v858_v62 }
 0x2a0   : > { %1137 = vmatmul.mubr.msk.bf16.vlgmr.msra.gmra.mrb[8].mxu0 %vm847_vm12, %v1171_v6 }
 0x2a1   : > { %1139 = vmatmul.mubr.msk.bf16.vlgmr.msra.gmra.mrb[8].mxu1 %vm847_vm12, %v1171_v6 }
 0x373   : > { %v897_v32 = vpop.f32.mrb[8].mxu0 }
 0x374   : > { %v957_v42 = vmul.f32 0.70710677, %v897_v32  ;;  %v940_v49 = vpop.f32.mrb[8].mxu1  ;;  %v899_v27 = vpop.f32.mrb[9].mxu0  ;;  %v949_v41 = vmul.f32 0.5, %v897_v32 }
 0x375   : > { %v959_v50 = vmul.f32 0.70710677, %v940_v49  ;;  %v958_v23 = vmul.f32 0.70710677, %v899_v27  ;;  %v942_v0 = vpop.f32.mrb[9].mxu1  ;;  %v901_v24 = vpop.f32.mrb[10].mxu0 }
 0x376   : > { %1188 = verf.f32 %v957_v42  ;;  %v960_v30 = vmul.f32 0.70710677, %v942_v0  ;;  %v944_v33 = vpop.f32.mrb[10].mxu1  ;;  %v903_v26 = vpop.f32.mrb[11].mxu0  ;;  %v961_v61 = vmul.f32 0.70710677, %v901_v24 }
 0x377   : > { %1190 = verf.f32 %v959_v50  ;;  %v963_v11 = vmul.f32 0.70710677, %v944_v33  ;;  %v946_v29 = vpop.f32.mrb[11].mxu1  ;;  %v962_v54 = vmul.f32 0.70710677, %v903_v26  ;;  %v951_v55 = vmul.f32 0.5, %v940_v49 }
 0x378   : > { %1192 = verf.f32 %v958_v23  ;;  %v964_v14 = vmul.f32 0.70710677, %v946_v29  ;;  %v950_v60 = vmul.f32 0.5, %v899_v27  ;;  %v952_v35 = vmul.f32 0.5, %v942_v0 }
 0x379   : > { %1194 = verf.f32 %v960_v30  ;;  %v953_v25 = vmul.f32 0.5, %v901_v24  ;;  %v955_v58 = vmul.f32 0.5, %v944_v33  ;;  %v954_v6 = vmul.f32 0.5, %v903_v26 }
 0x37a   : > { %1196 = verf.f32 %v961_v61  ;;  %v956_v49 = vmul.f32 0.5, %v946_v29 }
 0x37b   : > { %1198 = verf.f32 %v963_v11 }
 0x37c   : > { %1200 = verf.f32 %v962_v54 }
 0x37d   : > { %1202 = verf.f32 %v964_v14 }
 0x380   : > { %v1189_v51 = vpop.eup %1188 }
 0x381   : > { %v1191_v9 = vpop.eup %1190  ;;  %v973_v13 = vadd.f32 1.0, %v1189_v51 }
 0x382   : > { %v1193_v48 = vpop.eup %1192  ;;  %v975_v34 = vadd.f32 1.0, %v1191_v9 }
 0x383   : > { %v1195_v16 = vpop.eup %1194  ;;  %v981_v46 = vmul.f32 %v973_v13, %v949_v41  ;;  %v974_v43 = vadd.f32 1.0, %v1193_v48 }
 0x384   : > { %v1197_v56 = vpop.eup %1196  ;;  %v983_v44 = vmul.f32 %v975_v34, %v951_v55  ;;  %v976_v18 = vadd.f32 1.0, %v1195_v16 }
 0x385   : > { %v1199_v20 = vpop.eup %1198  ;;  %v997_v47 = vadd.f32 %v989_v45, %v981_v46  ;;  %v982_v21 = vmul.f32 %v974_v43, %v950_v60  ;;  %v977_v22 = vadd.f32 1.0, %v1197_v56 }
 0x386   : > { %v999_v10 = vadd.f32 %v991_v38, %v983_v44  ;;  %v984_v17 = vmul.f32 %v976_v18, %v952_v35  ;;  %v979_v57 = vadd.f32 1.0, %v1199_v20  ;;  %v1201_v59 = vpop.eup %1200 }
 0x387   : > { %v1013_v15 = vmul.f32 0.70710677, %v997_v47  ;;  %v998_v52 = vadd.f32 %v990_v31, %v982_v21  ;;  %v985_v39 = vmul.f32 %v977_v22, %v953_v25  ;;  %v1203_v40 = vpop.eup %1202  ;;  %v978_v32 = vadd.f32 1.0, %v1201_v59 }
 0x388   : > { %v1015_v3 = vmul.f32 0.70710677, %v999_v10  ;;  %v1000_v63 = vadd.f32 %v992_v8, %v984_v17  ;;  %v987_v5 = vmul.f32 %v979_v57, %v955_v58  ;;  %v980_v27 = vadd.f32 1.0, %v1203_v40 }
 0x389   : > { %1204 = verf.f32 %v1013_v15  ;;  %v1014_v36 = vmul.f32 0.70710677, %v998_v52  ;;  %v1001_v4 = vadd.f32 %v993_v37, %v985_v39  ;;  %v986_v50 = vmul.f32 %v978_v32, %v954_v6 }
 0x38a   : > { %1206 = verf.f32 %v1015_v3  ;;  %v1016_v7 = vmul.f32 0.70710677, %v1000_v63  ;;  %v1003_v28 = vadd.f32 %v995_v19, %v987_v5  ;;  %v988_v23 = vmul.f32 %v980_v27, %v956_v49 }
 0x38b   : > { %1208 = verf.f32 %v1014_v36  ;;  %v1017_v62 = vmul.f32 0.70710677, %v1001_v4  ;;  %v1002_v0 = vadd.f32 %v994_v53, %v986_v50  ;;  %v1005_v61 = vmul.f32 0.5, %v997_v47 }
 0x38c   : > { %1210 = verf.f32 %v1016_v7  ;;  %v1019_v42 = vmul.f32 0.70710677, %v1003_v28  ;;  %v1004_v1 = vadd.f32 %v996_v12, %v988_v23  ;;  %v1007_v29 = vmul.f32 0.5, %v999_v10 }
 0x38d   : > { %1212 = verf.f32 %v1017_v62  ;;  %v1018_v24 = vmul.f32 0.70710677, %v1002_v0  ;;  %v1006_v9 = vmul.f32 0.5, %v998_v52  ;;  %v1008_v38 = vmul.f32 0.5, %v1000_v63 }
 0x38e   : > { %1214 = verf.f32 %v1019_v42  ;;  %v1020_v30 = vmul.f32 0.70710677, %v1004_v1  ;;  %v1009_v31 = vmul.f32 0.5, %v1001_v4  ;;  %v1011_v46 = vmul.f32 0.5, %v1003_v28 }
 0x38f   : > { %1216 = verf.f32 %v1018_v24  ;;  %v1010_v35 = vmul.f32 0.5, %v1002_v0  ;;  %v1012_v19 = vmul.f32 0.5, %v1004_v1 }
 0x390   : > { %1218 = verf.f32 %v1020_v30 }
 0x393   : > { %v1205_v33 = vpop.eup %1204 }
 0x394   : > { %v1207_v2 = vpop.eup %1206  ;;  %v1029_v11 = vadd.f32 1.0, %v1205_v33 }
 0x395   : > { %v1209_v26 = vpop.eup %1208  ;;  %v1031_v54 = vadd.f32 1.0, %v1207_v2 }
 0x396   : > { %v1211_v14 = vpop.eup %1210  ;;  %v1037_v51 = vmul.f32 %v1029_v11, %v1005_v61  ;;  %v1030_v41 = vadd.f32 1.0, %v1209_v26 }
 0x397   : > { %v1213_v13 = vpop.eup %1212  ;;  %v1039_v45 = vmul.f32 %v1031_v54, %v1007_v29  ;;  %v1032_v48 = vadd.f32 1.0, %v1211_v14 }
 0x398   : > { %v1215_v55 = vpop.eup %1214  ;;  %1045 = vst [vmem:[%s1668_s23] sm:$0xff] %v1037_v51  ;;  %v1038_v34 = vmul.f32 %v1030_v41, %v1006_v9  ;;  %v1033_v8 = vadd.f32 1.0, %v1213_v13 }
 0x399   : > { %1140 = vst [vmem:[%s1668_s23 + $0x20] sm:$0xff] %v1039_v45  ;;  %v1040_v16 = vmul.f32 %v1032_v48, %v1008_v38  ;;  %v1035_v60 = vadd.f32 1.0, %v1215_v55  ;;  %v1217_v56 = vpop.eup %1216 }
 0x39a   : > { %1046 = vst [vmem:[%s1668_s23 + $0x8] sm:$0xff] %v1038_v34  ;;  %v1041_v43 = vmul.f32 %v1033_v8, %v1009_v31  ;;  %v1219_v44 = vpop.eup %1218  ;;  %v1034_v18 = vadd.f32 1.0, %v1217_v56 }
 0x39b   : > { %1141 = vst [vmem:[%s1668_s23 + $0x28] sm:$0xff] %v1040_v16  ;;  %v1043_v37 = vmul.f32 %v1035_v60, %v1011_v46  ;;  %v1036_v20 = vadd.f32 1.0, %v1219_v44 }
 0x39c   : > { %1047 = vst [vmem:[%s1668_s23 + $0x10] sm:$0xff] %v1041_v43  ;;  %v1042_v47 = vmul.f32 %v1034_v18, %v1010_v35 }
 0x39d   : > { %1142 = vst [vmem:[%s1668_s23 + $0x30] sm:$0xff] %v1043_v37  ;;  %v1044_v21 = vmul.f32 %v1036_v20, %v1012_v19 }
 0x39e   : > { %1048 = vst [vmem:[%s1668_s23 + $0x18] sm:$0xff] %v1042_v47 }
 0x39f   : > { %1143 = vst [vmem:[%s1668_s23 + $0x38] sm:$0xff] %v1044_v21 }
 0x3a0 PF: > { %s15_s18 = sadd.s32 1, %s1226_s18  }
 0x3a1   : > { %p12_p4 = scmp.ge.s32.totalorder %s15_s18, 4  }
 0x3a3   :  { %14 = sbr.rel (!%p12_p4) target bundleno = 1 (0x1), region = 72 }

</bundles_post_ra>
